<compile_context>
chip_gen: v5e
topology: v5e:2x2
jax: 0.10.0
libtpu: 0.0.40
codegen_flags: <defaults>
</compile_context>

<pallas_src>
import functools
import math

import jax
import jax.numpy as jnp
import numpy as np
from jax.experimental import pallas as pl
from jax.experimental.pallas import tpu as pltpu


def _round_up(x, m):
    return ((x + m - 1) // m) * m


# ----------------------------------------------------------------------------
# Kernel. Grid = (batch tiles ["parallel"], K tiles of D ["arbitrary"]).
#   h_acc += x_tile(bf16) @ W1_ktile           (f32 accumulate in VMEM scratch)
#   on last K step:  h = relu(h_acc + b1)
#                    out = h(bf16) @ [Wmu|Wsig] + [bmu|bsig]   (bf16 store)
# ----------------------------------------------------------------------------
def _encoder_kernel(x_ref, w1_ref, b1_ref, wms_ref, bms_ref, out_ref, h_acc):
    k = pl.program_id(1)

    @pl.when(k == 0)
    def _():
        h_acc[...] = jnp.zeros_like(h_acc)

    # In-kernel bf16 cast of the f32 x tile (VPU) -> MXU matmul, f32 accumulate.
    h_acc[...] += jnp.dot(x_ref[...].astype(jnp.bfloat16), w1_ref[...],
                          preferred_element_type=jnp.float32)

    @pl.when(k == pl.num_programs(1) - 1)
    def _():
        h = jnp.maximum(h_acc[...] + b1_ref[...], 0.0)           # f32 tail
        out = jnp.dot(h.astype(jnp.bfloat16), wms_ref[...],
                      preferred_element_type=jnp.float32)
        out_ref[...] = (out + bms_ref[...]).astype(out_ref.dtype)


# ----------------------------------------------------------------------------
# One-time offline packing of the PyTorch-style parameters.
# ----------------------------------------------------------------------------
def pack_encoder_params(params):
    """Pad to 128-lane multiples, fuse fc2/fc3 into one projection, cast bf16."""
    in_size, hidden = params["w1"].shape
    latent = params["w_mu"].shape[1]
    Dp = _round_up(in_size, 128)
    Hp = _round_up(hidden, 128)
    Lp = _round_up(2 * latent, 128)

    w1p = jnp.pad(params["w1"], ((0, Dp - in_size), (0, Hp - hidden))
                  ).astype(jnp.bfloat16)
    b1p = jnp.pad(params["b1"], (0, Hp - hidden)).reshape(1, Hp).astype(jnp.float32)
    wms = jnp.concatenate([params["w_mu"], params["w_sigma"]], axis=1)
    wmsp = jnp.pad(wms, ((0, Hp - hidden), (0, Lp - 2 * latent))
                   ).astype(jnp.bfloat16)
    bms = jnp.concatenate([params["b_mu"], params["b_sigma"]])
    bmsp = jnp.pad(bms, (0, Lp - 2 * latent)).reshape(1, Lp).astype(jnp.float32)

    packed = {"w1": w1p, "b1": b1p, "wms": wmsp, "bms": bmsp}
    dims = {"in_size": in_size, "hidden": hidden, "latent": latent}
    return packed, dims


# ----------------------------------------------------------------------------
# Tile / VMEM heuristics (all trace-time Python ints).
# ----------------------------------------------------------------------------
def _vmem_capacity_bytes():
    try:
        return int(pltpu.get_tpu_info().vmem_capacity_bytes)
    except Exception:
        return 64 << 20  # conservative fallback = v7x per-TensorCore VMEM


def _pick_tile_b(B):
    # Big tiles amortize the ~0.35us/step overhead, but keep >=2 batch steps
    # when the batch allows it so both v7x TensorCores get work.
    for t in (512, 256, 128):
        if B >= 2 * t:
            return t
    if B <= 128:
        return B  # single full-batch block (block dim == full array dim is legal)
    return 128


def _pick_tile_k(Dp, Hp, tile_b, budget_bytes):
    """Largest 128-multiple K tile that divides Dp while the double-buffered
    f32 x tile + bf16 W1 tile stay within ~half the VMEM budget."""
    per_k = 2 * (4 * tile_b + 2 * Hp)            # bytes per K element (x dbuf + W1 dbuf)
    cap = max(128, ((budget_bytes // 2) // per_k) // 128 * 128)
    tk = min(Dp, cap)
    while tk > 128 and Dp % tk != 0:
        tk -= 128
    return tk


# ----------------------------------------------------------------------------
# Forward wrapper (params already packed offline).
# ----------------------------------------------------------------------------
@functools.partial(jax.jit, static_argnames=("latent",))
def encoder_forward(x_nchw, packed, *, latent):
    """x_nchw: (B, C, H, W) float32. Returns (mu, sigma), each (B, latent) f32."""
    B = x_nchw.shape[0]
    D = math.prod(x_nchw.shape[1:])
    x = x_nchw.reshape(B, D)                      # torch.flatten(x, start_dim=1)

    Dp, Hp = packed["w1"].shape
    Lp = packed["wms"].shape[1]

    # Only if the flattened feature dim is not lane-aligned: zero-pad K (exact,
    # since the packed W1 has zero rows there).  No-op for aligned shapes.
    if D != Dp:
        x = jnp.pad(x, ((0, 0), (0, Dp - D)))

    vmem_cap = _vmem_capacity_bytes()
    budget = int(0.8 * vmem_cap)
    tile_b = _pick_tile_b(B)
    tile_k = _pick_tile_k(Dp, Hp, tile_b, budget)
    grid = (pl.cdiv(B, tile_b), Dp // tile_k)

    # VMEM budget estimate (double-buffered pipelined blocks + scratch) with
    # headroom, clamped below physical capacity of the current generation.
    est = (2 * tile_b * tile_k * 4        # f32 x tiles
           + 2 * tile_k * Hp * 2          # bf16 W1 K-tiles
           + 2 * Hp * Lp * 2              # bf16 [Wmu|Wsig]
           + 2 * (Hp + Lp) * 4            # biases
           + 2 * tile_b * Lp * 2          # bf16 output tiles
           + tile_b * Hp * 4)             # f32 h accumulator scratch
    vmem_bytes = min(max(int(1.5 * est) + (2 << 20), 16 << 20), int(0.85 * vmem_cap))

    out = pl.pallas_call(
        _encoder_kernel,
        out_shape=jax.ShapeDtypeStruct((B, Lp), jnp.bfloat16),
        grid_spec=pltpu.PrefetchScalarGridSpec(
            num_scalar_prefetch=0,
            grid=grid,
            in_specs=[
                pl.BlockSpec((tile_b, tile_k), lambda i, k: (i, k)),  # x (f32, pipelined)
                pl.BlockSpec((tile_k, Hp), lambda i, k: (k, 0)),      # W1 K-tiles
                pl.BlockSpec((1, Hp), lambda i, k: (0, 0)),           # b1
                pl.BlockSpec((Hp, Lp), lambda i, k: (0, 0)),          # [Wmu|Wsig]
                pl.BlockSpec((1, Lp), lambda i, k: (0, 0)),           # [bmu|bsig]
            ],
            out_specs=pl.BlockSpec((tile_b, Lp), lambda i, k: (i, 0)),
            scratch_shapes=[pltpu.VMEM((tile_b, Hp), jnp.float32)],
        ),
        compiler_params=pltpu.CompilerParams(
            dimension_semantics=("parallel", "arbitrary"),
            vmem_limit_bytes=vmem_bytes,
        ),
    )(x, packed["w1"], packed["b1"], packed["wms"], packed["bms"])

    mu = out[:, :latent].astype(jnp.float32)
    sigma = out[:, latent:2 * latent].astype(jnp.float32)
    return mu, sigma


# ----------------------------------------------------------------------------
# Param init (PyTorch nn.Linear-style) and pure-JAX reference.
# ----------------------------------------------------------------------------
def init_params(key, in_size, hid_size, latent_dim):
    ks = jax.random.split(key, 6)

    def linear(kw, kb, fin, fout):
        bound = 1.0 / float(np.sqrt(fin))
        w = jax.random.uniform(kw, (fin, fout), jnp.float32, -bound, bound)
        b = jax.random.uniform(kb, (fout,), jnp.float32, -bound, bound)
        return w, b

    w1, b1 = linear(ks[0], ks[1], in_size, hid_size)
    w_mu, b_mu = linear(ks[2], ks[3], hid_size, latent_dim)
    w_sg, b_sg = linear(ks[4], ks[5], hid_size, latent_dim)
    return {"w1": w1, "b1": b1, "w_mu": w_mu, "b_mu": b_mu,
            "w_sigma": w_sg, "b_sigma": b_sg}


def _reference(x_nchw, params):
    B = x_nchw.shape[0]
    x = x_nchw.reshape(B, -1)
    h = jnp.maximum(x @ params["w1"] + params["b1"], 0.0)
    mu = h @ params["w_mu"] + params["b_mu"]
    sigma = h @ params["w_sigma"] + params["b_sigma"]
    return mu, sigma


if __name__ == "__main__":
    B, C, H, W = 2, 4, 16, 16
    D = C * H * W
    HIDDEN, LATENT = 32, 8

    key = jax.random.PRNGKey(0)
    k_x, k_p = jax.random.split(key, 2)

    x = jax.random.uniform(k_x, (B, C, H, W), jnp.float32)
    params = init_params(k_p, D, HIDDEN, LATENT)

    packed, dims = pack_encoder_params(params)          # one-time offline packing
    mu, sigma = encoder_forward(x, packed, latent=dims["latent"])
    jax.block_until_ready((mu, sigma))

    assert mu.shape == (B, LATENT) and sigma.shape == (B, LATENT)

    mu_ref, sigma_ref = _reference(x, params)
    np.testing.assert_allclose(np.asarray(mu), np.asarray(mu_ref),
                               atol=1e-1, rtol=1e-1)
    np.testing.assert_allclose(np.asarray(sigma), np.asarray(sigma_ref),
                               atol=1e-1, rtol=1e-1)

    print("KERNEL_OK")
</pallas_src>

<mosaic_0001>
module attributes {stable_mosaic.version = 11 : i64} {
  func.func @_encoder_kernel(%arg0: i32, %arg1: i32, %arg2: memref<2x1024xf32, #tpu.memory_space<vmem>>, %arg3: memref<1024x128xbf16, #tpu.memory_space<vmem>>, %arg4: memref<1x128xf32, #tpu.memory_space<vmem>>, %arg5: memref<128x128xbf16, #tpu.memory_space<vmem>>, %arg6: memref<1x128xf32, #tpu.memory_space<vmem>>, %arg7: memref<2x128xbf16, #tpu.memory_space<vmem>>, %arg8: memref<2x128xf32, #tpu.memory_space<vmem>>) attributes {dimension_semantics = [#tpu.dimension_semantics<parallel>, #tpu.dimension_semantics<arbitrary>], iteration_bounds = array<i64: 1, 1>, scalar_prefetch = 0 : i64, scratch_operands = 1 : i64, tpu.core_type = #tpu.core_type<tc>, window_params = [{transform_indices = @transform_0, window_bounds = array<i64: 2, 1024>}, {transform_indices = @transform_1, window_bounds = array<i64: 1024, 128>}, {pipeline_mode = #tpu.pipeline_mode<synchronous>, transform_indices = @transform_2, window_bounds = array<i64: 1, 128>}, {pipeline_mode = #tpu.pipeline_mode<synchronous>, transform_indices = @transform_3, window_bounds = array<i64: 128, 128>}, {pipeline_mode = #tpu.pipeline_mode<synchronous>, transform_indices = @transform_4, window_bounds = array<i64: 1, 128>}, {transform_indices = @transform_5, window_bounds = array<i64: 2, 128>}]} {
    %c0_i32 = arith.constant 0 : i32
    %0 = arith.cmpi eq, %arg1, %c0_i32 : i32
    %1 = arith.extui %0 : i1 to i32
    %c0_i32_0 = arith.constant 0 : i32
    %2 = arith.cmpi ne, %1, %c0_i32_0 : i32
    scf.if %2 {
      %cst_10 = arith.constant 0.000000e+00 : f32
      %13 = vector.broadcast %cst_10 : f32 to vector<2x128xf32>
      %c0_11 = arith.constant 0 : index
      %c0_12 = arith.constant 0 : index
      %14 = vector.load %arg8[%c0_11, %c0_12] : memref<2x128xf32, #tpu.memory_space<vmem>>, vector<2x128xf32>
      tpu.vector_store %arg8[%c0_11, %c0_12], %13 {strides = array<i32>} : memref<2x128xf32, #tpu.memory_space<vmem>>, vector<2x128xf32>,
    } else {
    }
    %c0 = arith.constant 0 : index
    %c0_1 = arith.constant 0 : index
    %3 = vector.load %arg8[%c0, %c0_1] : memref<2x128xf32, #tpu.memory_space<vmem>>, vector<2x128xf32>
    %c0_2 = arith.constant 0 : index
    %c0_3 = arith.constant 0 : index
    %4 = vector.load %arg2[%c0_2, %c0_3] : memref<2x1024xf32, #tpu.memory_space<vmem>>, vector<2x1024xf32>
    %5 = arith.truncf %4 : vector<2x1024xf32> to vector<2x1024xbf16>
    %c0_4 = arith.constant 0 : index
    %c0_5 = arith.constant 0 : index
    %6 = vector.load %arg3[%c0_4, %c0_5] : memref<1024x128xbf16, #tpu.memory_space<vmem>>, vector<1024x128xbf16>
    %cst = arith.constant dense<0.000000e+00> : vector<2x128xf32>
    %7 = tpu.matmul %5, %6, %cst {dimension_numbers = #tpu.dot_dimension_numbers<[1], [0], [0], [1], [0, 0, 1, 1], [], []>} : vector<2x1024xbf16>, vector<1024x128xbf16>, vector<2x128xf32> -> vector<2x128xf32>
    %8 = arith.addf %3, %7 : vector<2x128xf32>
    %c0_6 = arith.constant 0 : index
    %c0_7 = arith.constant 0 : index
    %9 = vector.load %arg8[%c0_6, %c0_7] : memref<2x128xf32, #tpu.memory_space<vmem>>, vector<2x128xf32>
    tpu.vector_store %arg8[%c0_6, %c0_7], %8 {strides = array<i32>} : memref<2x128xf32, #tpu.memory_space<vmem>>, vector<2x128xf32>,
    %c0_i32_8 = arith.constant 0 : i32
    %10 = arith.cmpi eq, %arg1, %c0_i32_8 : i32
    %11 = arith.extui %10 : i1 to i32
    %c0_i32_9 = arith.constant 0 : i32
    %12 = arith.cmpi ne, %11, %c0_i32_9 : i32
    scf.if %12 {
      %c0_10 = arith.constant 0 : index
      %c0_11 = arith.constant 0 : index
      %13 = vector.load %arg8[%c0_10, %c0_11] : memref<2x128xf32, #tpu.memory_space<vmem>>, vector<2x128xf32>
      %c0_12 = arith.constant 0 : index
      %c0_13 = arith.constant 0 : index
      %14 = vector.load %arg4[%c0_12, %c0_13] : memref<1x128xf32, #tpu.memory_space<vmem>>, vector<1x128xf32>
      %15 = vector.broadcast %14 : vector<1x128xf32> to vector<2x128xf32>
      %16 = arith.addf %13, %15 : vector<2x128xf32>
      %cst_14 = arith.constant 0.000000e+00 : f32
      %17 = vector.broadcast %cst_14 : f32 to vector<2x128xf32>
      %18 = arith.maximumf %16, %17 : vector<2x128xf32>
      %19 = arith.truncf %18 : vector<2x128xf32> to vector<2x128xbf16>
      %c0_15 = arith.constant 0 : index
      %c0_16 = arith.constant 0 : index
      %20 = vector.load %arg5[%c0_15, %c0_16] : memref<128x128xbf16, #tpu.memory_space<vmem>>, vector<128x128xbf16>
      %cst_17 = arith.constant dense<0.000000e+00> : vector<2x128xf32>
      %21 = tpu.matmul %19, %20, %cst_17 {dimension_numbers = #tpu.dot_dimension_numbers<[1], [0], [0], [1], [0, 0, 1, 1], [], []>} : vector<2x128xbf16>, vector<128x128xbf16>, vector<2x128xf32> -> vector<2x128xf32>
      %c0_18 = arith.constant 0 : index
      %c0_19 = arith.constant 0 : index
      %22 = vector.load %arg6[%c0_18, %c0_19] : memref<1x128xf32, #tpu.memory_space<vmem>>, vector<1x128xf32>
      %23 = vector.broadcast %22 : vector<1x128xf32> to vector<2x128xf32>
      %24 = arith.addf %21, %23 : vector<2x128xf32>
      %25 = arith.truncf %24 : vector<2x128xf32> to vector<2x128xbf16>
      %c0_20 = arith.constant 0 : index
      %c0_21 = arith.constant 0 : index
      %26 = vector.load %arg7[%c0_20, %c0_21] : memref<2x128xbf16, #tpu.memory_space<vmem>>, vector<2x128xbf16>
      tpu.vector_store %arg7[%c0_20, %c0_21], %25 {strides = array<i32>} : memref<2x128xbf16, #tpu.memory_space<vmem>>, vector<2x128xbf16>,
    } else {
    }
    return
  }
  func.func @transform_0(%arg0: i32, %arg1: i32) -> (i32, i32) {
    %c0_i32 = arith.constant 0 : i32
    return %arg0, %arg1 : i32, i32
  }
  func.func @transform_1(%arg0: i32, %arg1: i32) -> (i32, i32) {
    %c0_i32 = arith.constant 0 : i32
    %c0_i32_0 = arith.constant 0 : i32
    return %arg1, %c0_i32 : i32, i32
  }
  func.func @transform_2(%arg0: i32, %arg1: i32) -> (i32, i32) {
    %c0_i32 = arith.constant 0 : i32
    %c0_i32_0 = arith.constant 0 : i32
    %c0_i32_1 = arith.constant 0 : i32
    return %c0_i32, %c0_i32_0 : i32, i32
  }
  func.func @transform_3(%arg0: i32, %arg1: i32) -> (i32, i32) {
    %c0_i32 = arith.constant 0 : i32
    %c0_i32_0 = arith.constant 0 : i32
    %c0_i32_1 = arith.constant 0 : i32
    return %c0_i32, %c0_i32_0 : i32, i32
  }
  func.func @transform_4(%arg0: i32, %arg1: i32) -> (i32, i32) {
    %c0_i32 = arith.constant 0 : i32
    %c0_i32_0 = arith.constant 0 : i32
    %c0_i32_1 = arith.constant 0 : i32
    return %c0_i32, %c0_i32_0 : i32, i32
  }
  func.func @transform_5(%arg0: i32, %arg1: i32) -> (i32, i32) {
    %c0_i32 = arith.constant 0 : i32
    %c0_i32_0 = arith.constant 0 : i32
    return %arg0, %c0_i32 : i32, i32
  }
}

</mosaic_0001>

<bundles_post_ra>
// kernel: encoder_forward.1
= control target key start
LH: loop header
LB: loop body
LE: loop exit
PB: predicated region body
PF: predicated region fallthrough
CT: control target
= control target key end

     0   :  { %10 = vsyncpa [#allocation4], 0  ;;  %s1182_s21 = smov [#allocation3]   ;;  %s1183_s23 = smov 64   ;;  %s1258_s0 = inlined_call_operand.vmem [shape: f32[2,1024], index: 0, kind: input, shape index: {}]   ;;  %s1259_s1 = inlined_call_operand.hbm [shape: bf16[1024,128], index: 1, kind: input, shape index: {}]   ;;  %s1260_s2 = inlined_call_operand.vmem [shape: f32[1,128], index: 2, kind: input, shape index: {}]   ;;  %s1261_s3 = inlined_call_operand.vmem [shape: bf16[128,128], index: 3, kind: input, shape index: {}]   ;;  %s1262_s4 = inlined_call_operand.vmem [shape: f32[1,128], index: 4, kind: input, shape index: {}]   ;;  %s1263_s5 = inlined_call_operand.vmem [shape: bf16[2,128], index: 5, kind: output, shape index: {}]  }
   0x1   :  { %s17_s20 = sshll.u32 %s1259_s1, 4  ;;  %s19_s22 = sshll.u32 %s1182_s21, 4  ;;  %s18_s20 = int_to_ptr.hbm [resolvable:$true] %s17_s20  ;;  %s20_s22 = int_to_ptr.vmem [resolvable:$true] %s19_s22 }
   0x2   :  { %s1184_s24 = smov 4  }
   0x3   :  { %25 = dma.hbm_to_vmem [thread:$0]  %s18_s20, 8192, %s20_s22, [#allocation4], %s1183_s23, %s1183_s23, %s1184_s24  }
   0x4   :  { %1180 = dma.done.wait [#allocation4], 8192  }
   0x5   :  { %1181 = vsyncadd [#allocation4], 4294959104  ;;  %v1085_v0 = vld [vmem:[#allocation3 + $0x38] sm:$0xff]  ;;  %v1084_v4 = vld [vmem:[#allocation3 + $0x30] sm:$0xff] }
   0x6   :  { %v1093_v1 = vld [vmem:[#allocation3 + $0x78] sm:$0xff]  ;;  %585 = vmatpush.bf16.msra.mxu0 %v1085_v0  ;;  %v1092_v5 = vld [vmem:[#allocation3 + $0x70] sm:$0xff]  ;;  %v1083_v8 = vld [vmem:[#allocation3 + $0x28] sm:$0xff] }
   0x7   :  { %v1101_v2 = vld [vmem:[#allocation3 + $0xb8] sm:$0xff]  ;;  %598 = vmatpush.bf16.msra.mxu1 %v1093_v1  ;;  %v1100_v6 = vld [vmem:[#allocation3 + $0xb0] sm:$0xff]  ;;  %v1091_v9 = vld [vmem:[#allocation3 + $0x68] sm:$0xff] }
   0x8   :  { %v1109_v3 = vld [vmem:[#allocation3 + $0xf8] sm:$0xff]  ;;  %611 = vmatpush.bf16.msra.mxu2 %v1101_v2  ;;  %v1108_v7 = vld [vmem:[#allocation3 + $0xf0] sm:$0xff]  ;;  %v1099_v10 = vld [vmem:[#allocation3 + $0xa8] sm:$0xff] }
   0x9   :  { %624 = vmatpush.bf16.msra.mxu3 %v1109_v3  ;;  %v1107_v11 = vld [vmem:[#allocation3 + $0xe8] sm:$0xff]  ;;  %v1082_v12 = vld [vmem:[#allocation3 + $0x20] sm:$0xff]  ;;  %v42_v16 = vld [vmem:[%s1258_s0] sm:$0xff] }
   0xa   :  { %586 = vmatpush.bf16.msra.mxu0 %v1084_v4  ;;  %v1090_v13 = vld [vmem:[#allocation3 + $0x60] sm:$0xff]  ;;  %v1081_v17 = vld [vmem:[#allocation3 + $0x18] sm:$0xff]  ;;  %46 = vst [vmem:[#allocation1] ss:$4 sm:$0xff] %v42_v16  ;;  %v1080_v21 = vld [vmem:[#allocation3 + $0x10] sm:$0xff] }
   0xb   :  { %599 = vmatpush.bf16.msra.mxu1 %v1092_v5  ;;  %v1098_v14 = vld [vmem:[#allocation3 + $0xa0] sm:$0xff]  ;;  %v1089_v18 = vld [vmem:[#allocation3 + $0x58] sm:$0xff]  ;;  %v1088_v22 = vld [vmem:[#allocation3 + $0x50] sm:$0xff] }
   0xc   :  { %612 = vmatpush.bf16.msra.mxu2 %v1100_v6  ;;  %v1106_v15 = vld [vmem:[#allocation3 + $0xe0] sm:$0xff]  ;;  %v1097_v19 = vld [vmem:[#allocation3 + $0x98] sm:$0xff]  ;;  %v1096_v23 = vld [vmem:[#allocation3 + $0x90] sm:$0xff] }
   0xd   :  { %625 = vmatpush.bf16.msra.mxu3 %v1108_v7  ;;  %v1105_v20 = vld [vmem:[#allocation3 + $0xd8] sm:$0xff]  ;;  %v1104_v24 = vld [vmem:[#allocation3 + $0xd0] sm:$0xff]  ;;  %v1079_v25 = vld [vmem:[#allocation3 + $0x8] sm:$0xff] }
   0xe   :  { %587 = vmatpush.bf16.msra.mxu0 %v1083_v8  ;;  %v1087_v26 = vld [vmem:[#allocation3 + $0x48] sm:$0xff]  ;;  %v43_v29 = vld [vmem:[%s1258_s0 + $0x8] sm:$0xff]  ;;  %v1116_v46 = vld [vmem:[#allocation3 + $0x130] sm:$0xff] }
   0xf   :  { %600 = vmatpush.bf16.msra.mxu1 %v1091_v9  ;;  %v1095_v27 = vld [vmem:[#allocation3 + $0x88] sm:$0xff]  ;;  %v1078_v30 = vld [vmem:[#allocation3] sm:$0xff]  ;;  %48 = vst [vmem:[#allocation1 + $0x20] ss:$4 sm:$0xff] %v43_v29  ;;  %v1117_v34 = vld [vmem:[#allocation3 + $0x138] sm:$0xff] }
  0x10   :  { %613 = vmatpush.bf16.msra.mxu2 %v1099_v10  ;;  %v1103_v28 = vld [vmem:[#allocation3 + $0xc8] sm:$0xff]  ;;  %v1086_v31 = vld [vmem:[#allocation3 + $0x40] sm:$0xff]  ;;  %v1125_v35 = vld [vmem:[#allocation3 + $0x178] sm:$0xff] }
  0x11   :  { %626 = vmatpush.bf16.msra.mxu3 %v1107_v11  ;;  %v1094_v32 = vld [vmem:[#allocation3 + $0x80] sm:$0xff]  ;;  %v49_v37 = vld.sshfl [vmem:[#allocation1] sm:$0xff pattern:$0x73625140]  ;;  %v1115_v50 = vld [vmem:[#allocation3 + $0x128] sm:$0xff] }
  0x12   :  { %588 = vmatpush.bf16.msra.mxu0 %v1082_v12  ;;  %v1102_v33 = vld [vmem:[#allocation3 + $0xc0] sm:$0xff]  ;;  %v52_v38 = vld.sshfl [vmem:[#allocation1 + $0x18] sm:$0xff pattern:$0x73625140]  ;;  %v1133_v40 = vld [vmem:[#allocation3 + $0x1b8] sm:$0xff]  ;;  %v65_v43 = vpack.c.bf16 %v49_v37, %v49_v37 }
  0x13   :  { %601 = vmatpush.bf16.msra.mxu1 %v1090_v13  ;;  %v51_v36 = vld.sshfl [vmem:[#allocation1 + $0x10] sm:$0xff pattern:$0x73625140]  ;;  %v50_v39 = vld.sshfl [vmem:[#allocation1 + $0x8] sm:$0xff pattern:$0x73625140]  ;;  %v68_v44 = vpack.c.bf16 %v52_v38, %v52_v38 }
  0x14   :  { %614 = vmatpush.bf16.msra.mxu2 %v1098_v14  ;;  %v1141_v41 = vld [vmem:[#allocation3 + $0x1f8] sm:$0xff]  ;;  %v67_v42 = vpack.c.bf16 %v51_v36, %v51_v36  ;;  %v66_v45 = vpack.c.bf16 %v50_v39, %v50_v39  ;;  %v1124_v47 = vld [vmem:[#allocation3 + $0x170] sm:$0xff]  ;;  %v1123_v51 = vld [vmem:[#allocation3 + $0x168] sm:$0xff] }
  0x15   :  { %627 = vmatpush.bf16.msra.mxu3 %v1106_v15  ;;  %v1132_v48 = vld [vmem:[#allocation3 + $0x1b0] sm:$0xff]  ;;  %v1131_v52 = vld [vmem:[#allocation3 + $0x1a8] sm:$0xff]  ;;  %v1114_v54 = vld [vmem:[#allocation3 + $0x120] sm:$0xff] }
  0x16   :  { %589 = vmatpush.bf16.msra.mxu0 %v1081_v17  ;;  %v1140_v49 = vld [vmem:[#allocation3 + $0x1f0] sm:$0xff]  ;;  %v1139_v53 = vld [vmem:[#allocation3 + $0x1e8] sm:$0xff]  ;;  %v1122_v55 = vld [vmem:[#allocation3 + $0x160] sm:$0xff] }
  0x17   :  { %602 = vmatpush.bf16.msra.mxu1 %v1089_v18  ;;  %v1130_v56 = vld [vmem:[#allocation3 + $0x1a0] sm:$0xff]  ;;  %v1113_v58 = vld [vmem:[#allocation3 + $0x118] sm:$0xff]  ;;  %v1112_v62 = vld [vmem:[#allocation3 + $0x110] sm:$0xff] }
  0x18   :  { %615 = vmatpush.bf16.msra.mxu2 %v1097_v19  ;;  %v1138_v57 = vld [vmem:[#allocation3 + $0x1e0] sm:$0xff]  ;;  %v1121_v59 = vld [vmem:[#allocation3 + $0x158] sm:$0xff]  ;;  %v1120_v63 = vld [vmem:[#allocation3 + $0x150] sm:$0xff] }
  0x19   :  { %628 = vmatpush.bf16.msra.mxu3 %v1105_v20  ;;  %v1129_v60 = vld [vmem:[#allocation3 + $0x198] sm:$0xff]  ;;  %v1128_v0 = vld [vmem:[#allocation3 + $0x190] sm:$0xff]  ;;  %v1111_v2 = vld [vmem:[#allocation3 + $0x108] sm:$0xff] }
  0x1a   :  { %590 = vmatpush.bf16.msra.mxu0 %v1080_v21  ;;  %v1137_v61 = vld [vmem:[#allocation3 + $0x1d8] sm:$0xff]  ;;  %v1136_v1 = vld [vmem:[#allocation3 + $0x1d0] sm:$0xff]  ;;  %v1119_v3 = vld [vmem:[#allocation3 + $0x148] sm:$0xff] }
  0x1b   :  { %603 = vmatpush.bf16.msra.mxu1 %v1088_v22  ;;  %v1127_v4 = vld [vmem:[#allocation3 + $0x188] sm:$0xff]  ;;  %v1110_v6 = vld [vmem:[#allocation3 + $0x100] sm:$0xff]  ;;  %v53_v10 = vld.sshfl [vmem:[#allocation1 + $0x20] sm:$0xff pattern:$0x73625140] }
  0x1c   :  { %616 = vmatpush.bf16.msra.mxu2 %v1096_v23  ;;  %v1135_v5 = vld [vmem:[#allocation3 + $0x1c8] sm:$0xff]  ;;  %v1118_v7 = vld [vmem:[#allocation3 + $0x140] sm:$0xff]  ;;  %v69_v14 = vpack.c.bf16 %v53_v10, %v53_v10  ;;  %v1185_v23 = vmov 0.0  }
  0x1d   :  { %629 = vmatpush.bf16.msra.mxu3 %v1104_v24  ;;  %v1126_v8 = vld [vmem:[#allocation3 + $0x180] sm:$0xff]  ;;  %v56_v13 = vld.sshfl [vmem:[#allocation1 + $0x38] sm:$0xff pattern:$0x73625140]  ;;  %40 = vst [vmem:[#allocation2] sm:$0x3] %v1185_v23 }
  0x1e   :  { %591 = vmatpush.bf16.msra.mxu0 %v1079_v25  ;;  %v1134_v9 = vld [vmem:[#allocation3 + $0x1c0] sm:$0xff]  ;;  %v72_v17 = vpack.c.bf16 %v56_v13, %v56_v13  ;;  %v1149_v18 = vld [vmem:[%s1261_s3 + $0x38] sm:$0xff]  ;;  %v1146_v24 = vld [vmem:[%s1261_s3 + $0x20] sm:$0xff] }
  0x1f   :  { %604 = vmatpush.bf16.msra.mxu1 %v1087_v26  ;;  %v54_v11 = vld.sshfl [vmem:[#allocation1 + $0x28] sm:$0xff pattern:$0x73625140]  ;;  %v55_v12 = vld.sshfl [vmem:[#allocation1 + $0x30] sm:$0xff pattern:$0x73625140] }
  0x20   :  { %617 = vmatpush.bf16.msra.mxu2 %v1095_v27  ;;  %v70_v15 = vpack.c.bf16 %v54_v11, %v54_v11  ;;  %v71_v16 = vpack.c.bf16 %v55_v12, %v55_v12  ;;  %v1148_v19 = vld [vmem:[%s1261_s3 + $0x30] sm:$0xff]  ;;  %v1147_v21 = vld [vmem:[%s1261_s3 + $0x28] sm:$0xff] }
  0x21   :  { %630 = vmatpush.bf16.msra.mxu3 %v1103_v28  ;;  %v1145_v28 = vld [vmem:[%s1261_s3 + $0x18] sm:$0xff] }
  0x22   :  { %592 = vmatpush.bf16.msra.mxu0 %v1078_v30  ;;  %v1144_v30 = vld [vmem:[%s1261_s3 + $0x10] sm:$0xff] }
  0x23   :  { %605 = vmatpush.bf16.msra.mxu1 %v1086_v31 }
  0x24   :  { %618 = vmatpush.bf16.msra.mxu2 %v1094_v32  ;;  %v1143_v32 = vld [vmem:[%s1261_s3 + $0x8] sm:$0xff] }
  0x25   :  { %631 = vmatpush.bf16.msra.mxu3 %v1102_v33  ;;  %593 = vmatmul.bf16.vlgmr.msra.gmra.mxu0 %v65_v43 }
  0x26   :  { %637 = vmatpush.bf16.msrb.mxu0 %v1117_v34  ;;  %606 = vmatmul.bf16.vlgmr.msra.gmra.mxu1 %v66_v45  ;;  %v1142_v34 = vld [vmem:[%s1261_s3] sm:$0xff] }
  0x27   :  { %650 = vmatpush.bf16.msrb.mxu1 %v1125_v35  ;;  %619 = vmatmul.bf16.vlgmr.msra.gmra.mxu2 %v67_v42 }
  0x28   :  { %663 = vmatpush.bf16.msrb.mxu2 %v1133_v40  ;;  %632 = vmatmul.bf16.vlgmr.msra.gmra.mxu3 %v68_v44 }
  0x29   :  { %676 = vmatpush.bf16.msrb.mxu3 %v1141_v41 }
  0x2a   :  { %638 = vmatpush.bf16.msrb.mxu0 %v1116_v46 }
  0x2b   :  { %651 = vmatpush.bf16.msrb.mxu1 %v1124_v47  ;;  %v41_v47 = vld [vmem:[#allocation2] sm:$0x3] }
  0x2c   :  { %664 = vmatpush.bf16.msrb.mxu2 %v1132_v48 }
  0x2d   :  { %677 = vmatpush.bf16.msrb.mxu3 %v1140_v49 }
  0x2e   :  { %639 = vmatpush.bf16.msrb.mxu0 %v1115_v50 }
  0x2f   :  { %652 = vmatpush.bf16.msrb.mxu1 %v1123_v51 }
  0x30   :  { %665 = vmatpush.bf16.msrb.mxu2 %v1131_v52  ;;  %v1154_v52 = vld [vmem:[%s1260_s2] ss:$0 sm:$0xff] }
  0x31   :  { %678 = vmatpush.bf16.msrb.mxu3 %v1139_v53 }
  0x32   :  { %640 = vmatpush.bf16.msrb.mxu0 %v1114_v54 }
  0x33   :  { %653 = vmatpush.bf16.msrb.mxu1 %v1122_v55 }
  0x34   :  { %666 = vmatpush.bf16.msrb.mxu2 %v1130_v56 }
  0x35   :  { %679 = vmatpush.bf16.msrb.mxu3 %v1138_v57  ;;  %v1155_v57 = vld [vmem:[%s1262_s4] ss:$0 sm:$0xff] }
  0x36   :  { %641 = vmatpush.bf16.msrb.mxu0 %v1113_v58 }
  0x37   :  { %654 = vmatpush.bf16.msrb.mxu1 %v1121_v59 }
  0x38   :  { %667 = vmatpush.bf16.msrb.mxu2 %v1129_v60 }
  0x39   :  { %680 = vmatpush.bf16.msrb.mxu3 %v1137_v61 }
  0x3a   :  { %642 = vmatpush.bf16.msrb.mxu0 %v1112_v62 }
  0x3b   :  { %655 = vmatpush.bf16.msrb.mxu1 %v1120_v63 }
  0x3c   :  { %668 = vmatpush.bf16.msrb.mxu2 %v1128_v0 }
  0x3d   :  { %681 = vmatpush.bf16.msrb.mxu3 %v1136_v1 }
  0x3e   :  { %643 = vmatpush.bf16.msrb.mxu0 %v1111_v2 }
  0x3f   :  { %656 = vmatpush.bf16.msrb.mxu1 %v1119_v3 }
  0x40   :  { %669 = vmatpush.bf16.msrb.mxu2 %v1127_v4 }
  0x41   :  { %682 = vmatpush.bf16.msrb.mxu3 %v1135_v5 }
  0x42   :  { %644 = vmatpush.bf16.msrb.mxu0 %v1110_v6 }
  0x43   :  { %657 = vmatpush.bf16.msrb.mxu1 %v1118_v7 }
  0x44   :  { %670 = vmatpush.bf16.msrb.mxu2 %v1126_v8 }
  0x45   :  { %683 = vmatpush.bf16.msrb.mxu3 %v1134_v9  ;;  %645 = vmatmul.bf16.vlgmr.msrb.gmra.mxu0 %v69_v14 }
  0x46   :  { %658 = vmatmul.bf16.vlgmr.msrb.gmra.mxu1 %v70_v15  ;;  %770 = vmatpush.bf16.msra.mxu0 %v1149_v18 }
  0x47   :  { %671 = vmatmul.bf16.vlgmr.msrb.gmra.mxu2 %v71_v16 }
  0x48   :  { %684 = vmatmul.bf16.vlgmr.msrb.gmra.mxu3 %v72_v17 }
  0x4a   :  { %771 = vmatpush.bf16.msra.mxu0 %v1148_v19 }
  0x4e   :  { %772 = vmatpush.bf16.msra.mxu0 %v1147_v21 }
  0x52   :  { %773 = vmatpush.bf16.msra.mxu0 %v1146_v24 }
  0x56   :  { %774 = vmatpush.bf16.msra.mxu0 %v1145_v28 }
  0x5a   :  { %775 = vmatpush.bf16.msra.mxu0 %v1144_v30 }
  0x5e   :  { %776 = vmatpush.bf16.msra.mxu0 %v1143_v32 }
  0x62   :  { %777 = vmatpush.bf16.msra.mxu0 %v1142_v34 }
  0xa2   :  { %v594_v20 = vpop.f32.mrf.mxu0 }
  0xa3   :  { %v607_v22 = vpop.f32.mrf.mxu1 }
  0xa4   :  { %v608_v35 = vadd.f32 %v607_v22, %v594_v20 }
  0xaa   :  { %v620_v25 = vpop.f32.mrf.mxu2  ;;  %v596_v27 = vpop.f32.mrf.mxu0 }
  0xab   :  { %v633_v26 = vpop.f32.mrf.mxu3  ;;  %v609_v29 = vpop.f32.mrf.mxu1  ;;  %v621_v36 = vadd.f32 %v620_v25, %v608_v35 }
  0xad   :  { %v634_v37 = vadd.f32 %v633_v26, %v621_v36 }
  0xb2   :  { %v622_v31 = vpop.f32.mrf.mxu2 }
  0xb3   :  { %v635_v33 = vpop.f32.mrf.mxu3 }
  0xc2   :  { %v646_v38 = vpop.f32.mrf.mxu0 }
  0xc3   :  { %v659_v39 = vpop.f32.mrf.mxu1  ;;  %v647_v40 = vadd.f32 %v646_v38, %v634_v37 }
  0xc5   :  { %v660_v41 = vadd.f32 %v659_v39, %v647_v40 }
  0xca   :  { %v672_v42 = vpop.f32.mrf.mxu2  ;;  %v648_v45 = vpop.f32.mrf.mxu0 }
  0xcb   :  { %v685_v43 = vpop.f32.mrf.mxu3  ;;  %v673_v44 = vadd.f32 %v672_v42, %v660_v41  ;;  %v661_v46 = vpop.f32.mrf.mxu1 }
  0xcd   :  { %v686_v48 = vadd.f32 %v685_v43, %v673_v44 }
  0xcf   :  { %v689_v49 = vadd.f32 %v686_v48, %v41_v47 }
  0xd1   :  { %690 = vst [vmem:[#allocation2] sm:$0x3] %v689_v49 }
  0xd2   :  { %v674_v50 = vpop.f32.mrf.mxu2 }
  0xd3   :  { %v687_v51 = vpop.f32.mrf.mxu3 }
  0xd8   :  { %v694_v53 = vld [vmem:[#allocation2] sm:$0x3] }
  0xd9   :  { %v699_v54 = vadd.f32 %v1154_v52, %v694_v53 }
  0xdb   :  { %v700_v55 = vmax.f32 %v699_v54, 0.0 }
  0xdd   :  { %v701_v56 = vpack.c.bf16 %v700_v55, %v700_v55 }
  0xdf   :  { %778 = vmatmul.bf16.vlgmr.msra.gmra.mxu0 %v701_v56 }
 0x15c   :  { %v779_v58 = vpop.f32.mrf.mxu0 }
 0x15d   :  { %v780_v59 = vadd.f32 %v1155_v57, %v779_v58 }
 0x15f   :  { %v783_v60 = vpack.c.bf16 %v780_v59, %v780_v59 }
 0x161   :  { %784 = vst [vmem:[%s1263_s5] sm:$0x1] %v783_v60 }
 0x164   :  { %v781_v61 = vpop.f32.mrf.mxu0 }
 0x165   :  { %789 = vsyncpa [#allocation4], 1 }

</bundles_post_ra>
